<compile_context>
chip_gen: v7x
topology: tpu7x:2x2x1
jax: 0.10.0
libtpu: 0.0.40
codegen_flags: <defaults>
</compile_context>

<pallas_src>
import math
import functools

import jax
import jax.numpy as jnp
from jax.experimental import pallas as pl
from jax.experimental.pallas import tpu as pltpu


_LANE_CANDIDATES = (1024, 512, 256, 128)   # widest lane dim that divides N wins
_TARGET_BLOCK_ELEMS = 256 * 1024           # ~1 MiB of f32 per block


def _cosine_cutoff_kernel(d_ref, o_ref, *, a, b, cutoff_lower, cutoff_upper, has_lower):
    d = d_ref[...]
    if has_lower:
        arg = a * d + b                                   # folded scalar math
        keep = (d > cutoff_lower) & (d < cutoff_upper)    # single select below
    else:
        arg = a * d
        keep = d < cutoff_upper
    o_ref[...] = jnp.where(keep, 0.5 * jnp.cos(arg) + 0.5, 0.0).astype(o_ref.dtype)


def _cosine_cutoff_ref(distances, cutoff_lower=0.0, cutoff_upper=5.0):
    """Pure-jnp reference (identical math to the PyTorch module)."""
    d = jnp.asarray(distances)
    if cutoff_lower > 0:
        c = 0.5 * (
            jnp.cos(
                math.pi
                * (2.0 * (d - cutoff_lower) / (cutoff_upper - cutoff_lower) + 1.0)
            )
            + 1.0
        )
        c = c * (d < cutoff_upper).astype(d.dtype)
        c = c * (d > cutoff_lower).astype(d.dtype)
        return c
    c = 0.5 * (jnp.cos(d * math.pi / cutoff_upper) + 1.0)
    return c * (d < cutoff_upper).astype(d.dtype)


def cosine_cutoff(distances, cutoff_lower=0.0, cutoff_upper=5.0, *,
                  min_pallas_elems=1024, block_rows=None):
    """Pallas TPU implementation of CosineCutoff.forward (any input shape)."""
    d = jnp.asarray(distances)
    orig_shape = d.shape
    n = d.size
    cl = float(cutoff_lower)
    cu = float(cutoff_upper)

    # Tiny inputs: ~one vreg of work; kernel launch overhead dominates.
    # (In the real model this op should simply be fused into the producer.)
    if n == 0 or n < min_pallas_elems:
        return _cosine_cutoff_ref(d, cl, cu)

    flat = d.reshape(-1)

    # Widest lane dim that makes the 2-D view free (no pad, no slice).
    lane = None
    for c in _LANE_CANDIDATES:
        if n % c == 0:
            lane = c
            break

    if lane is None:
        # Ragged N: one pad copy in + one slice copy out. Unavoidable for a flat
        # non-128-divisible buffer; fix properly by keeping distances padded
        # end-to-end in the caller.
        lane = 128
        rows = pl.cdiv(n, lane)
        flat = jnp.pad(flat, (0, rows * lane - n))
        was_padded = True
    else:
        rows = n // lane
        was_padded = False

    x2d = flat.reshape(rows, lane)

    if block_rows is None:
        block_rows = _TARGET_BLOCK_ELEMS // lane          # multiple of 8
        if block_rows >= rows:
            block_rows = rows                             # full extent is always legal
    grid = (pl.cdiv(rows, block_rows),)                   # exact grid; edge blocks masked

    has_lower = cl > 0
    if has_lower:
        a = 2.0 * math.pi / (cu - cl)
        b = math.pi * (1.0 - 2.0 * cl / (cu - cl))
    else:
        a = math.pi / cu
        b = 0.0

    kernel = functools.partial(
        _cosine_cutoff_kernel,
        a=a, b=b, cutoff_lower=cl, cutoff_upper=cu, has_lower=has_lower,
    )

    out2d = pl.pallas_call(
        kernel,
        out_shape=jax.ShapeDtypeStruct((rows, lane), x2d.dtype),
        grid=grid,
        in_specs=[pl.BlockSpec((block_rows, lane), lambda i: (i, 0))],
        out_specs=pl.BlockSpec((block_rows, lane), lambda i: (i, 0)),
        compiler_params=pltpu.CompilerParams(
            # "parallel" lets Mosaic shard the row axis across TensorCores on
            # multi-core parts; on v7x an explicit CORE_PARALLEL / core_map split
            # would guarantee both TCs stream HBM (kept portable here).
            dimension_semantics=("parallel",),
        ),
    )(x2d)

    out = out2d.reshape(-1)
    if was_padded:
        out = out[:n]
    return out.reshape(orig_shape)


if __name__ == "__main__":
    key = jax.random.PRNGKey(0)
    k1, k2, k3 = jax.random.split(key, 3)

    # Flat edge-distance vectors at small, realistic sizes.
    d_even = jax.random.uniform(k1, (6144,), jnp.float32, minval=0.0, maxval=7.0)
    d_ragged = jax.random.uniform(k2, (5000,), jnp.float32, minval=0.0, maxval=7.0)
    d_tiny = jax.random.uniform(k3, (200,), jnp.float32, minval=0.0, maxval=7.0)

    # lower = 0 branch, 128-divisible size -> zero-copy (no pad / no slice) path.
    out = jax.block_until_ready(cosine_cutoff(d_even, 0.0, 5.0))
    assert out.shape == d_even.shape
    assert jnp.allclose(out, _cosine_cutoff_ref(d_even, 0.0, 5.0), atol=1e-5), \
        "mismatch (lower=0, aligned)"

    # lower > 0 branch.
    out = jax.block_until_ready(cosine_cutoff(d_even, 1.0, 5.0))
    assert jnp.allclose(out, _cosine_cutoff_ref(d_even, 1.0, 5.0), atol=1e-5), \
        "mismatch (lower>0, aligned)"

    # Ragged N through the kernel; small block_rows forces a masked edge block
    # (rows=40, block_rows=16 -> grid=3 with a partial last block).
    out = jax.block_until_ready(cosine_cutoff(d_ragged, 0.0, 5.0, block_rows=16))
    assert out.shape == d_ragged.shape
    assert jnp.allclose(out, _cosine_cutoff_ref(d_ragged, 0.0, 5.0), atol=1e-5), \
        "mismatch (ragged, masked edge block)"

    # Tiny N forced through the kernel (full-extent block).
    out = jax.block_until_ready(cosine_cutoff(d_tiny, 0.0, 5.0, min_pallas_elems=0))
    assert jnp.allclose(out, _cosine_cutoff_ref(d_tiny, 0.0, 5.0), atol=1e-5), \
        "mismatch (tiny, kernel path)"

    # Tiny N default path (plain-XLA fallback, per perf feedback).
    out = jax.block_until_ready(cosine_cutoff(d_tiny, 0.0, 5.0))
    assert jnp.allclose(out, _cosine_cutoff_ref(d_tiny, 0.0, 5.0), atol=1e-5), \
        "mismatch (tiny, fallback path)"

    print("KERNEL_OK")
</pallas_src>

<mosaic_0001>
module attributes {stable_mosaic.version = 11 : i64} {
  func.func @_cosine_cutoff_kernel(%arg0: i32, %arg1: memref<6x1024xf32, #tpu.memory_space<vmem>>, %arg2: memref<6x1024xf32, #tpu.memory_space<vmem>>) attributes {dimension_semantics = [#tpu.dimension_semantics<parallel>], iteration_bounds = array<i64: 1>, scalar_prefetch = 0 : i64, scratch_operands = 0 : i64, tpu.core_type = #tpu.core_type<tc>, window_params = [{transform_indices = @transform_0, window_bounds = array<i64: 6, 1024>}, {transform_indices = @transform_1, window_bounds = array<i64: 6, 1024>}]} {
    %c0 = arith.constant 0 : index
    %c0_0 = arith.constant 0 : index
    %0 = vector.load %arg1[%c0, %c0_0] : memref<6x1024xf32, #tpu.memory_space<vmem>>, vector<6x1024xf32>
    %cst = arith.constant 0.628318548 : f32
    %1 = vector.broadcast %cst : f32 to vector<6x1024xf32>
    %2 = arith.mulf %1, %0 : vector<6x1024xf32>
    %cst_1 = arith.constant 5.000000e+00 : f32
    %3 = vector.broadcast %cst_1 : f32 to vector<6x1024xf32>
    %4 = arith.cmpf olt, %0, %3 : vector<6x1024xf32>
    %5 = math.cos %2 : vector<6x1024xf32>
    %cst_2 = arith.constant 5.000000e-01 : f32
    %6 = vector.broadcast %cst_2 : f32 to vector<6x1024xf32>
    %7 = arith.mulf %6, %5 : vector<6x1024xf32>
    %cst_3 = arith.constant 5.000000e-01 : f32
    %8 = vector.broadcast %cst_3 : f32 to vector<6x1024xf32>
    %9 = arith.addf %7, %8 : vector<6x1024xf32>
    %cst_4 = arith.constant 0.000000e+00 : f32
    %10 = vector.broadcast %cst_4 : f32 to vector<6x1024xf32>
    %11 = arith.select %4, %9, %10 : vector<6x1024xi1>, vector<6x1024xf32>
    %c0_5 = arith.constant 0 : index
    %c0_6 = arith.constant 0 : index
    %12 = vector.load %arg2[%c0_5, %c0_6] : memref<6x1024xf32, #tpu.memory_space<vmem>>, vector<6x1024xf32>
    tpu.vector_store %arg2[%c0_5, %c0_6], %11 {strides = array<i32>} : memref<6x1024xf32, #tpu.memory_space<vmem>>, vector<6x1024xf32>,
    return
  }
  func.func @transform_0(%arg0: i32) -> (i32, i32) {
    %c0_i32 = arith.constant 0 : i32
    %c0_i32_0 = arith.constant 0 : i32
    return %arg0, %c0_i32 : i32, i32
  }
  func.func @transform_1(%arg0: i32) -> (i32, i32) {
    %c0_i32 = arith.constant 0 : i32
    %c0_i32_0 = arith.constant 0 : i32
    return %arg0, %c0_i32 : i32, i32
  }
}

</mosaic_0001>

<bundles_post_ra>
// kernel: tpu_custom_call.1
= control target key start
LH: loop header
LB: loop body
LE: loop exit
PB: predicated region body
PF: predicated region fallthrough
CT: control target
= control target key end

     0   :  { %6 = vsyncpa [#allocation3], 0  ;;  %s1825_s0 = inlined_call_operand.hbm [shape: f32[6,1024], index: 0, kind: input, shape index: {}]   ;;  %s1826_s1 = inlined_call_operand.hbm [shape: f32[6,1024], index: 1, kind: output, shape index: {}]  }
   0x1   :  { %7 = vsyncpa [#allocation4], 0  ;;  %s1074_s6 = smov [#allocation2]   ;;  %s1026_s10 = scalar_lea.hbm %s1825_s0, 1024 }
   0x2   :  { %s14_s7 = sshll.u32 %s1074_s6, 4  ;;  %p1027_p0 = scmp.ne.s32.totalorder %s1825_s0, %s1026_s10  ;;  %s15_s7 = int_to_ptr.vmem [resolvable:$true] %s14_s7 }
   0x3   :  { %p1030_p1 = scmp.lt.u32.totalorder %s1026_s10, %s1825_s0 }
   0x5   :  { %p1032_p2 = pnand %p1030_p1, %p1027_p0 }
   0x7   :  { %1035 = shalt.err (!%p1032_p2)
}
   0x8   :  { %s1036_s15 = scalar_lea.vmem %s15_s7, 1024  ;;  %p1041_p4 = scmp.lt.s32.totalorder %s15_s7, %s15_s7 }
   0x9   :  { %p1037_p3 = scmp.ne.s32.totalorder %s15_s7, %s1036_s15  ;;  %p1042_p5 = scmp.lt.s32.totalorder %s1036_s15, %s1036_s15 }
   0xb   :  { %p1043_p6 = por %p1042_p5, %p1041_p4 }
   0xd   :  { %p1044_p7 = pnand %p1043_p6, %p1037_p3 }
   0xf   :  { %1047 = shalt.err (!%p1044_p7)
}
  0x10   :  { %17 = dma.hbm_to_vmem [thread:$0]  %s1825_s0, 1024, %s15_s7, [#allocation3]  }
  0x11   :  { %1070 = dma.done.wait [#allocation3], 1024  }
  0x12   :  { %1071 = vsyncadd [#allocation3], 4294966272  ;;  %v21_v0 = vld [vmem:[#allocation2] sm:$0x3f]  ;;  %v22_v1 = vld [vmem:[#allocation2 + $0x8] sm:$0x3f] }
  0x13   :  { %v23_v2 = vld [vmem:[#allocation2 + $0x10] sm:$0x3f]  ;;  %v1104_v3 = vmul.f32 0.62831855, %v21_v0  ;;  %v1106_v4 = vmul.f32 0.62831855, %v22_v1 }
  0x14   :  { %v1108_v5 = vmul.f32 0.62831855, %v23_v2  ;;  %v1075_v33 = vmov 683565275   ;;  %v1076_v35 = vmov 2475754826  }
  0x15   :  { %v45_v6 = vand.u32 2147483647, %v1104_v3  ;;  %v48_v7 = vand.u32 2139095040, %v1104_v3  ;;  %v148_v8 = vand.u32 2147483647, %v1106_v4  ;;  %v151_v9 = vand.u32 2139095040, %v1106_v4 }
  0x16   :  { %v254_v14 = vand.u32 2139095040, %v1108_v5  ;;  %v251_v27 = vand.u32 2147483647, %v1108_v5  ;;  %v1077_v37 = vmov 2131351028   ;;  %s1081_s0 = smov [#allocation5]  }
  0x17   :  { %v49_v10 = vshrl.u32 %v48_v7, 23  ;;  %v52_v11 = vand.u32 8388607, %v45_v6  ;;  %v152_v12 = vshrl.u32 %v151_v9, 23  ;;  %v155_v13 = vand.u32 8388607, %v148_v8 }
  0x18   :  { %v255_v17 = vshrl.u32 %v254_v14, 23  ;;  %v1078_v39 = vmov 2102212464   ;;  %v1079_v41 = vmov 920167782   ;;  %s907_s18 = sshll.u32 %s1081_s0, 4  ;;  %s908_s18 = int_to_ptr.vmem [resolvable:$true] %s907_s18 }
  0x19   :  { %v916_v15 = vadd.s32 4294967169, %v49_v10  ;;  %v920_v16 = vadd.s32 4294967169, %v152_v12  ;;  %v53_v19 = vor.u32 8388608, %v52_v11  ;;  %v156_v20 = vor.u32 8388608, %v155_v13  ;;  %s1048_s19 = scalar_lea.vmem %s908_s18, 1024  ;;  %p1053_p9 = scmp.lt.s32.totalorder %s908_s18, %s908_s18 }
  0x1a   :  { %v924_v22 = vadd.s32 4294967169, %v255_v17  ;;  %v1080_v49 = vmov 1326507024   ;;  %p1049_p8 = scmp.ne.s32.totalorder %s908_s18, %s1048_s19  ;;  %p1054_p10 = scmp.lt.s32.totalorder %s1048_s19, %s1048_s19 }
  0x1b   :  { %v55_v18 = vadd.s32 1, %v916_v15  ;;  %v158_v21 = vadd.s32 1, %v920_v16  ;;  %v1120_v28 = vshll.u32 %v53_v19, 8  ;;  %v1122_v30 = vshll.u32 %v156_v20, 8 }
  0x1c   :  { %v1124_v31 = vadd.s32 1, %v924_v22  ;;  %p1055_p11 = por %p1054_p10, %p1053_p9 }
  0x1d   :  { %vm56_vm0 = vcmp.gt.s32.totalorder %v55_v18, 0  ;;  %vm159_vm1 = vcmp.gt.s32.totalorder %v158_v21, 0 }
  0x1e   :  { %v57_v23 = vsel %vm56_vm0, %v55_v18, 0  ;;  %v160_v26 = vsel %vm159_vm1, %v158_v21, 0  ;;  %vm262_vm6 = vcmp.gt.s32.totalorder %v1124_v31, 0  ;;  %p1056_p12 = pnand %p1055_p11, %p1049_p8 }
  0x1f   :  { %v58_v24 = vshrl.u32 %v57_v23, 5  ;;  %v59_v25 = vand.u32 31, %v57_v23  ;;  %v162_v29 = vand.u32 31, %v160_v26  ;;  %v1131_v43 = vshrl.u32 %v160_v26, 5 }
  0x21   :  { %v60_v32 = vsub.s32 32, %v59_v25  ;;  %v62_v34 = vshll.u32 %v1075_v33, %v59_v25  ;;  %v65_v36 = vshll.u32 %v1076_v35, %v59_v25  ;;  %v68_v38 = vshll.u32 %v1077_v37, %v59_v25 }
  0x22   :  { %v71_v40 = vshll.u32 %v1078_v39, %v59_v25  ;;  %v74_v42 = vshll.u32 %v1079_v41, %v59_v25  ;;  %vm77_vm2 = vcmp.lt.s32.totalorder %v58_v24, 1  ;;  %vm78_vm3 = vcmp.lt.s32.totalorder %v58_v24, 2 }
  0x23   :  { %v61_v44 = vshrl.u32 %v1075_v33, %v60_v32  ;;  %v63_v45 = vshrl.u32 %v1076_v35, %v60_v32  ;;  %v66_v46 = vshrl.u32 %v1077_v37, %v60_v32  ;;  %v69_v47 = vshrl.u32 %v1078_v39, %v60_v32 }
  0x24   :  { %v72_v48 = vshrl.u32 %v1079_v41, %v60_v32  ;;  %v75_v50 = vshrl.u32 %v1080_v49, %v60_v32  ;;  %vm80_vm4 = vcmp.lt.s32.totalorder %v58_v24, 4  ;;  %v163_v54 = vsub.s32 32, %v162_v29 }
  0x25   :  { %v64_v51 = vor.u32 %v63_v45, %v62_v34  ;;  %v67_v52 = vor.u32 %v66_v46, %v65_v36  ;;  %v70_v53 = vor.u32 %v69_v47, %v68_v38  ;;  %vm79_vm5 = vcmp.lt.s32.totalorder %v58_v24, 3  ;;  %v24_v47 = vld [vmem:[#allocation2 + $0x18] sm:$0x3f] }
  0x26   :  { %v73_v55 = vor.u32 %v72_v48, %v71_v40  ;;  %v76_v56 = vor.u32 %v75_v50, %v74_v42  ;;  %v165_v57 = vshll.u32 %v1075_v33, %v162_v29  ;;  %v168_v1 = vshll.u32 %v1076_v35, %v162_v29 }
  0x27   :  { %v81_v58 = vsel %vm77_vm2, %v61_v44, %v64_v51  ;;  %v82_v59 = vsel %vm80_vm4, %v70_v53, 2102212464  ;;  %v85_v60 = vsel %vm77_vm2, %v64_v51, %v67_v52  ;;  %v89_v61 = vsel %vm77_vm2, %v67_v52, %v70_v53 }
  0x28   :  { %v83_v62 = vsel %vm79_vm5, %v67_v52, %v82_v59  ;;  %v86_v63 = vsel %vm80_vm4, %v73_v55, 920167782  ;;  %v90_v0 = vsel %vm80_vm4, %v76_v56, 1326507024  ;;  %v164_v9 = vshrl.u32 %v1075_v33, %v163_v54 }
  0x29   :  { %v87_v2 = vsel %vm79_vm5, %v70_v53, %v86_v63  ;;  %v91_v7 = vsel %vm79_vm5, %v73_v55, %v90_v0  ;;  %v166_v10 = vshrl.u32 %v1076_v35, %v163_v54  ;;  %v84_v11 = vsel %vm78_vm3, %v81_v58, %v83_v62 }
  0x2a   :  { %v88_v12 = vsel %vm78_vm3, %v85_v60, %v87_v2  ;;  %v92_v13 = vsel %vm78_vm3, %v89_v61, %v91_v7  ;;  %v169_v14 = vshrl.u32 %v1077_v37, %v163_v54  ;;  %v171_v21 = vshll.u32 %v1077_v37, %v162_v29 }
  0x2b   :  { %v1152_v15 = vmul.u32.u64.low %v1120_v28, %v92_v13  ;;  %v1153_v16 = vmul.u32.u64.high %v1120_v28, %v92_v13, %v1152_v15  ;;  %v1156_v17 = vmul.u32.u64.low %v1120_v28, %v88_v12  ;;  %v1157_v18 = vmul.u32.u64.high %v1120_v28, %v88_v12, %v1156_v17 }
  0x2c   :  { %v167_v19 = vor.u32 %v166_v10, %v165_v57  ;;  %v170_v20 = vor.u32 %v169_v14, %v168_v1  ;;  %v172_v22 = vshrl.u32 %v1078_v39, %v163_v54  ;;  %v174_v23 = vshll.u32 %v1078_v39, %v162_v29 }
  0x2d   :  { %v175_v24 = vshrl.u32 %v1079_v41, %v163_v54  ;;  %v177_v25 = vshll.u32 %v1079_v41, %v162_v29  ;;  %v178_v26 = vshrl.u32 %v1080_v49, %v163_v54  ;;  %v100_v32 = vmul.u32 %v1120_v28, %v84_v11 }
  0x2e   :  { %v173_v34 = vor.u32 %v172_v22, %v171_v21  ;;  %vm180_vm7 = vcmp.lt.s32.totalorder %v1131_v43, 1  ;;  %vm181_vm8 = vcmp.lt.s32.totalorder %v1131_v43, 2  ;;  %vm102_vm9 = vc.u32 %v1153_v16, %v1156_v17 }
  0x2f   :  { %v103_v36 = vadd.s32 1, %v1157_v18  ;;  %v176_v38 = vor.u32 %v175_v24, %v174_v23  ;;  %vm182_vm10 = vcmp.lt.s32.totalorder %v1131_v43, 3  ;;  %v179_v40 = vor.u32 %v178_v26, %v177_v25 }
  0x30   :  { %vm183_vm11 = vcmp.lt.s32.totalorder %v1131_v43, 4  ;;  %v184_v29 = vsel %vm180_vm7, %v164_v9, %v167_v19  ;;  %v188_v42 = vsel %vm180_vm7, %v167_v19, %v170_v20  ;;  %v192_v46 = vsel %vm180_vm7, %v170_v20, %v173_v34 }
  0x31   :  { %v104_v28 = vsel %vm102_vm9, %v103_v36, %v1157_v18  ;;  %v185_v44 = vsel %vm183_vm11, %v173_v34, 2102212464  ;;  %v189_v45 = vsel %vm183_vm11, %v176_v38, 920167782  ;;  %v193_v52 = vsel %vm183_vm11, %v179_v40, 1326507024 }
  0x32   :  { %v105_v48 = vadd.s32 %v104_v28, %v100_v32  ;;  %v186_v50 = vsel %vm182_vm10, %v170_v20, %v185_v44  ;;  %v190_v51 = vsel %vm182_vm10, %v173_v34, %v189_v45  ;;  %v194_v55 = vsel %vm182_vm10, %v176_v38, %v193_v52 }
  0x33   :  { %v187_v53 = vsel %vm181_vm8, %v184_v29, %v186_v50  ;;  %v191_v54 = vsel %vm181_vm8, %v188_v42, %v190_v51  ;;  %v263_v56 = vsel %vm262_vm6, %v1124_v31, 0  ;;  %v195_v58 = vsel %vm181_vm8, %v192_v46, %v194_v55 }
  0x34   :  { %v106_v57 = vadd.s32 536870912, %v105_v48  ;;  %v1191_v59 = vmul.u32.u64.low %v1122_v30, %v191_v54  ;;  %v1192_v60 = vmul.u32.u64.high %v1122_v30, %v191_v54, %v1191_v59  ;;  %v1195_v61 = vmul.f32 0.62831855, %v24_v47 }
  0x35   :  { %v1198_v62 = vmul.u32.u64.low %v1122_v30, %v195_v58  ;;  %v1199_v63 = vmul.u32.u64.high %v1122_v30, %v195_v58, %v1198_v62  ;;  %v258_v0 = vand.u32 8388607, %v251_v27  ;;  %v265_v31 = vand.u32 31, %v263_v56 }
  0x36   :  { %v1203_v1 = vshrl.u32 %v106_v57, 30  ;;  %v203_v43 = vmul.u32 %v1122_v30, %v187_v53  ;;  %v206_v7 = vadd.s32 1, %v1192_v60  ;;  %v357_v11 = vand.u32 2139095040, %v1195_v61 }
  0x37   :  { %v266_v9 = vsub.s32 32, %v265_v31  ;;  %vm205_vm12 = vc.u32 %v1199_v63, %v1191_v59  ;;  %v259_v10 = vor.u32 8388608, %v258_v0  ;;  %v264_v14 = vshrl.u32 %v263_v56, 5 }
  0x38   :  { %v108_v2 = vshll.u32 %v1203_v1, 30  ;;  %v207_v13 = vsel %vm205_vm12, %v206_v7, %v1192_v60  ;;  %v268_v18 = vshll.u32 %v1075_v33, %v265_v31  ;;  %v271_v19 = vshll.u32 %v1076_v35, %v265_v31 }
  0x39   :  { %v208_v15 = vadd.s32 %v207_v13, %v203_v43  ;;  %v269_v30 = vshrl.u32 %v1076_v35, %v266_v9  ;;  %v272_v21 = vshrl.u32 %v1077_v37, %v266_v9  ;;  %v274_v22 = vshll.u32 %v1077_v37, %v265_v31 }
  0x3a   :  { %v109_v12 = vsub.s32 %v105_v48, %v108_v2  ;;  %v275_v23 = vshrl.u32 %v1078_v39, %v266_v9  ;;  %v277_v25 = vshll.u32 %v1078_v39, %v265_v31  ;;  %v1219_v26 = vshll.u32 %v259_v10, 8 }
  0x3b   :  { %v209_v24 = vadd.s32 536870912, %v208_v15  ;;  %v358_v32 = vshrl.u32 %v357_v11, 23  ;;  %v101_v34 = vadd.s32 %v1156_v17, %v1153_v16  ;;  %v267_v38 = vshrl.u32 %v1075_v33, %v266_v9 }
  0x3c   :  { %v111_v20 = vsub.s32 0, %v109_v12  ;;  %vm286_vm13 = vcmp.lt.s32.totalorder %v264_v14, 4  ;;  %v270_v29 = vor.u32 %v269_v30, %v268_v18  ;;  %v278_v42 = vshrl.u32 %v1079_v41, %v266_v9 }
  0x3d   :  { %v1224_v40 = vshrl.u32 %v209_v24, 30  ;;  %v280_v28 = vshll.u32 %v1079_v41, %v265_v31  ;;  %v273_v45 = vor.u32 %v272_v21, %v271_v19  ;;  %v276_v46 = vor.u32 %v275_v23, %v274_v22 }
  0x3e   :  { %v917_v36 = vmin.u32 %v111_v20, %v109_v12  ;;  %v281_v47 = vshrl.u32 %v1080_v49, %v266_v9  ;;  %v279_v50 = vor.u32 %v278_v42, %v277_v25  ;;  %vm283_vm14 = vcmp.lt.s32.totalorder %v264_v14, 1 }
  0x3f   :  { %v211_v48 = vshll.u32 %v1224_v40, 30  ;;  %vm285_vm15 = vcmp.lt.s32.totalorder %v264_v14, 3  ;;  %v288_v51 = vsel %vm286_vm13, %v276_v46, 2102212464  ;;  %v928_v52 = vadd.s32 4294967169, %v358_v32 }
  0x40   :  { %v113_v44 = vclz %v917_v36  ;;  %v282_v17 = vor.u32 %v281_v47, %v280_v28  ;;  %vm284_vm0 = vcmp.lt.s32.totalorder %v264_v14, 2  ;;  %v287_v54 = vsel %vm283_vm14, %v267_v38, %v270_v29 }
  0x41   :  { %v212_v53 = vsub.s32 %v208_v15, %v211_v48  ;;  %v292_v55 = vsel %vm286_vm13, %v279_v50, 920167782  ;;  %v291_v56 = vsel %vm283_vm14, %v270_v29, %v273_v45  ;;  %v289_v0 = vsel %vm285_vm15, %v273_v45, %v288_v51 }
  0x42   :  { %v918_v16 = vadd.s32 4294967294, %v113_v44  ;;  %v293_v57 = vsel %vm285_vm15, %v276_v46, %v292_v55  ;;  %v296_v58 = vsel %vm286_vm13, %v282_v17, 1326507024  ;;  %v295_v31 = vsel %vm283_vm14, %v273_v45, %v276_v46 }
  0x43   :  { %v214_v62 = vsub.s32 0, %v212_v53  ;;  %v297_v9 = vsel %vm285_vm15, %v279_v50, %v296_v58  ;;  %v294_v11 = vsel %vm284_vm0, %v291_v56, %v293_v57  ;;  %v290_v18 = vsel %vm284_vm0, %v287_v54, %v289_v0 }
  0x44   :  { %vm919_vm1 = vcmp.lt.s32.totalorder %v918_v16, 0  ;;  %v298_v30 = vsel %vm284_vm0, %v295_v31, %v297_v9  ;;  %v364_v22 = vadd.s32 1, %v928_v52  ;;  %v204_v14 = vadd.s32 %v1191_v59, %v1199_v63 }
  0x45   :  { %v116_v60 = vsel %vm919_vm1, 0, %v918_v16  ;;  %v921_v10 = vmin.u32 %v214_v62, %v212_v53  ;;  %v1243_v20 = vmul.u32.u64.low %v1219_v26, %v298_v30  ;;  %v1244_v21 = vmul.u32.u64.high %v1219_v26, %v298_v30, %v1243_v20 }
  0x46   :  { %v117_v43 = vsub.s32 32, %v116_v60  ;;  %v118_v2 = vshll.u32 %v109_v12, %v116_v60  ;;  %v121_v7 = vsub.s32 4294967266, %v116_v60  ;;  %vm365_vm2 = vcmp.gt.s32.totalorder %v364_v22, 0 }
  0x47   :  { %v216_v19 = vclz %v921_v10  ;;  %v1247_v24 = vmul.u32.u64.low %v1219_v26, %v294_v11  ;;  %v1248_v25 = vmul.u32.u64.high %v1219_v26, %v294_v11, %v1247_v24  ;;  %v354_v36 = vand.u32 2147483647, %v1195_v61 }
  0x48   :  { %v119_v13 = vshrl.u32 %v101_v34, %v117_v43  ;;  %v122_v15 = vadd.s32 127, %v121_v7  ;;  %v366_v38 = vsel %vm365_vm2, %v364_v22, 0  ;;  %v306_v42 = vmul.u32 %v1219_v26, %v290_v18 }
  0x49   :  { %v922_v32 = vadd.s32 4294967294, %v216_v19  ;;  %vm308_vm4 = vc.u32 %v1244_v21, %v1247_v24  ;;  %v309_v45 = vadd.s32 1, %v1248_v25  ;;  %v368_v46 = vand.u32 31, %v366_v38 }
  0x4a   :  { %v120_v23 = vor.u32 %v119_v13, %v118_v2  ;;  %v123_v12 = vshll.u32 %v122_v15, 23  ;;  %vm47_vm5 = vcmp.lt.s32.totalorder %v1104_v3, 0  ;;  %v361_v52 = vand.u32 8388607, %v354_v36 }
  0x4b   :  { %vm923_vm3 = vcmp.lt.s32.totalorder %v922_v32, 0  ;;  %v310_v59 = vsel %vm308_vm4, %v309_v45, %v1248_v25  ;;  %v369_v63 = vsub.s32 32, %v368_v46  ;;  %v371_v54 = vshll.u32 %v1075_v33, %v368_v46 }
  0x4c   :  { %v124_v34 = vor.u32 4788187, %v123_v12  ;;  %v127_v29 = vcvt.s32.f32 %v120_v23  ;;  %v219_v44 = vsel %vm923_vm3, 0, %v922_v32  ;;  %v311_v51 = vadd.s32 %v310_v59, %v306_v42 }
  0x4d   :  { %v220_v47 = vsub.s32 32, %v219_v44  ;;  %v221_v48 = vshll.u32 %v212_v53, %v219_v44  ;;  %v224_v50 = vsub.s32 4294967266, %v219_v44  ;;  %v372_v53 = vshrl.u32 %v1076_v35, %v369_v63 }
  0x4e   :  { %v125_v28 = vand.u32 2147483647, %v124_v34  ;;  %v312_v57 = vadd.s32 536870912, %v311_v51  ;;  %vm150_vm6 = vcmp.lt.s32.totalorder %v1106_v4, 0  ;;  %v367_v58 = vshrl.u32 %v366_v38, 5 }
  0x4f   :  { %v222_v16 = vshrl.u32 %v204_v14, %v220_v47  ;;  %v225_v17 = vadd.s32 127, %v224_v50  ;;  %v374_v60 = vshll.u32 %v1076_v35, %v368_v46  ;;  %v375_v62 = vshrl.u32 %v1077_v37, %v369_v63  ;;  %v1284_v34 = vld [vmem:[#allocation2 + $0x20] sm:$0x3f] }
  0x50   :  { %v128_v26 = vmul.f32 %v127_v29, %v125_v28  ;;  %v377_v0 = vshll.u32 %v1077_v37, %v368_v46  ;;  %v1268_v2 = vshrl.u32 %v312_v57, 30  ;;  %v378_v7 = vshrl.u32 %v1078_v39, %v369_v63 }
  0x51   :  { %v223_v55 = vor.u32 %v222_v16, %v221_v48  ;;  %v226_v56 = vshll.u32 %v225_v17, 23  ;;  %vm1273_vm7 = vcmp.le.f32.partialorder %v45_v6, 0.7853982  ;;  %v380_v11 = vshll.u32 %v1078_v39, %v368_v46  ;;  %v1293_v48 = vld [vmem:[#allocation2 + $0x28] sm:$0x3f] }
  0x52   :  { %v129_v10 = vxor.u32 2147483648, %v128_v26  ;;  %v381_v13 = vshrl.u32 %v1079_v41, %v369_v63  ;;  %v314_v18 = vshll.u32 %v1268_v2, 30  ;;  %v362_v30 = vor.u32 8388608, %v361_v52 }
  0x53   :  { %v227_v31 = vor.u32 4788187, %v226_v56  ;;  %v230_v43 = vcvt.s32.f32 %v223_v55  ;;  %v373_v19 = vor.u32 %v372_v53, %v371_v54  ;;  %v376_v20 = vor.u32 %v375_v62, %v374_v60 }
  0x54   :  { %v382_v22 = vor.u32 %v381_v13, %v380_v11  ;;  %v383_v23 = vshll.u32 %v1079_v41, %v368_v46  ;;  %v384_v12 = vshrl.u32 %v1080_v49, %v369_v63  ;;  %v1282_v25 = vsub.s32 %v311_v51, %v314_v18 }
  0x55   :  { %v228_v15 = vand.u32 2147483647, %v227_v31  ;;  %v379_v32 = vor.u32 %v378_v7, %v377_v0  ;;  %vm386_vm8 = vcmp.lt.s32.totalorder %v367_v58, 1  ;;  %v130_v14 = vsel %vm47_vm5, %v129_v10, %v128_v26 }
  0x56   :  { %v370_v38 = vshrl.u32 %v1075_v33, %v369_v63  ;;  %vm388_vm9 = vcmp.lt.s32.totalorder %v367_v58, 3  ;;  %vm389_vm10 = vcmp.lt.s32.totalorder %v367_v58, 4  ;;  %v317_v42 = vsub.s32 0, %v1282_v25 }
  0x57   :  { %v231_v6 = vmul.f32 %v230_v43, %v228_v15  ;;  %v385_v28 = vor.u32 %v384_v12, %v383_v23  ;;  %v391_v44 = vsel %vm389_vm10, %v379_v32, 2102212464  ;;  %vm387_vm11 = vcmp.lt.s32.totalorder %v367_v58, 2 }
  0x58   :  { %v394_v45 = vsel %vm386_vm8, %v373_v19, %v376_v20  ;;  %v395_v46 = vsel %vm389_vm10, %v382_v22, 920167782  ;;  %v402_v47 = vshll.u32 %v362_v30, 8  ;;  %v1296_v50 = vmul.f32 0.62831855, %v1284_v34 }
  0x59   :  { %v232_v29 = vxor.u32 2147483648, %v231_v6  ;;  %v133_v59 = vsel %vm1273_vm7, %v1104_v3, %v130_v14  ;;  %vm1303_vm12 = vcmp.le.f32.partialorder %v148_v8, 0.7853982  ;;  %v925_v16 = vmin.u32 %v317_v42, %v1282_v25 }
  0x5a   :  { %v390_v17 = vsel %vm386_vm8, %v370_v38, %v373_v19  ;;  %v392_v51 = vsel %vm388_vm9, %v376_v20, %v391_v44  ;;  %v396_v26 = vsel %vm388_vm9, %v379_v32, %v395_v46  ;;  %v398_v52 = vsel %vm386_vm8, %v376_v20, %v379_v32  ;;  %v28_v32 = vld [vmem:[#allocation2 + $0x38] sm:$0x3f] }
  0x5b   :  { %v233_v54 = vsel %vm150_vm6, %v232_v29, %v231_v6  ;;  %v319_v55 = vclz %v925_v16  ;;  %v397_v56 = vsel %vm387_vm11, %v394_v45, %v396_v26  ;;  %v399_v8 = vsel %vm389_vm10, %v385_v28, 1326507024 }
  0x5c   :  { %v1317_v57 = vmul.f32 0.62831855, %v1293_v48  ;;  %v400_v53 = vsel %vm388_vm9, %v382_v22, %v399_v8  ;;  %v1320_v60 = vmul.u32.u64.low %v402_v47, %v397_v56  ;;  %v1321_v62 = vmul.u32.u64.high %v402_v47, %v397_v56, %v1320_v60  ;;  %v27_v22 = vld [vmem:[#allocation2 + $0x30] sm:$0x3f] }
  0x5d   :  { %v131_v0 = vsub.s32 4, %v1203_v1  ;;  %v926_v31 = vadd.s32 4294967294, %v319_v55  ;;  %v393_v43 = vsel %vm387_vm11, %v390_v17, %v392_v51  ;;  %v401_v7 = vsel %vm387_vm11, %v398_v52, %v400_v53 }
  0x5e   :  { %988 = vcosq.f32 %v133_v59  ;;  %v236_v10 = vsel %vm1303_vm12, %v1106_v4, %v233_v54  ;;  %v1330_v11 = vmul.u32.u64.low %v402_v47, %v401_v7  ;;  %v1331_v13 = vmul.u32.u64.high %v402_v47, %v401_v7, %v1330_v11 }
  0x5f   :  { %990 = vsinq.f32 %v133_v59  ;;  %v307_v15 = vadd.s32 %v1247_v24, %v1244_v21  ;;  %vm927_vm13 = vcmp.lt.s32.totalorder %v926_v31, 0  ;;  %v460_v18 = vand.u32 2139095040, %v1296_v50 }
  0x60   :  { %v234_v30 = vsub.s32 4, %v1224_v40  ;;  %v322_v19 = vsel %vm927_vm13, 0, %v926_v31  ;;  %v409_v58 = vmul.u32 %v402_v47, %v393_v43  ;;  %v412_v20 = vadd.s32 1, %v1321_v62 }
  0x61   :  { %992 = vcosq.f32 %v236_v10  ;;  %v323_v23 = vsub.s32 32, %v322_v19  ;;  %v324_v12 = vshll.u32 %v1282_v25, %v322_v19  ;;  %v327_v6 = vsub.s32 4294967266, %v322_v19 }
  0x62   :  { %994 = vsinq.f32 %v236_v10  ;;  %vm411_vm14 = vc.u32 %v1331_v13, %v1320_v60  ;;  %v457_v21 = vand.u32 2147483647, %v1296_v50  ;;  %v461_v24 = vshrl.u32 %v460_v18, 23 }
  0x63   :  { %v132_v14 = vsel %vm47_vm5, %v131_v0, %v1203_v1  ;;  %v325_v38 = vshrl.u32 %v307_v15, %v323_v23  ;;  %v328_v29 = vadd.s32 127, %v327_v6  ;;  %v413_v42 = vsel %vm411_vm14, %v412_v20, %v1321_v62 }
  0x64   :  { %v235_v25 = vsel %vm150_vm6, %v234_v30, %v1224_v40  ;;  %v337_v28 = vsub.s32 4, %v1268_v2  ;;  %v414_v44 = vadd.s32 %v413_v42, %v409_v58  ;;  %v932_v45 = vadd.s32 4294967169, %v461_v24 }
  0x65   :  { %v1350_v46 = vmul.f32 0.62831855, %v27_v22  ;;  %v1352_v47 = vmul.f32 0.62831855, %v28_v32  ;;  %v326_v59 = vor.u32 %v325_v38, %v324_v12  ;;  %v329_v16 = vshll.u32 %v328_v29, 23 }
  0x66   :  { %vm253_vm15 = vcmp.lt.s32.totalorder %v1108_v5, 0  ;;  %v415_v1 = vadd.s32 536870912, %v414_v44  ;;  %v464_v17 = vand.u32 8388607, %v457_v21  ;;  %v467_v51 = vadd.s32 1, %v932_v45 }
  0x67   :  { %v134_v40 = vsel %vm1273_vm7, 0, %v132_v14  ;;  %v237_v26 = vsel %vm1303_vm12, 0, %v235_v25  ;;  %v330_v52 = vor.u32 4788187, %v329_v16  ;;  %v333_v54 = vcvt.s32.f32 %v326_v59 }
  0x68   :  { %v1361_v55 = vpop.eup %988  ;;  %v1366_v56 = vsel %vm253_vm15, %v337_v28, %v1268_v2  ;;  %v1368_v8 = vshrl.u32 %v415_v1, 30  ;;  %vm468_vm0 = vcmp.gt.s32.totalorder %v467_v51, 0  ;;  %v563_v53 = vand.u32 2139095040, %v1317_v57 }
  0x69   :  { %v1371_v62 = vpop.eup %990  ;;  %vm1375_vm1 = vcmp.le.f32.partialorder %v251_v27, 0.7853982  ;;  %v331_v63 = vand.u32 2147483647, %v330_v52  ;;  %v469_v0 = vsel %vm468_vm0, %v467_v51, 0  ;;  %v1379_v31 = vand.u32 3, %v134_v40 }
  0x6a   :  { %v1381_v43 = vand.u32 3, %v237_v26  ;;  %v417_v2 = vshll.u32 %v1368_v8, 30  ;;  %v465_v7 = vor.u32 8388608, %v464_v17  ;;  %v144_v11 = vxor.u32 2147483648, %v1361_v55 }
  0x6b   :  { %v1384_v10 = vpop.eup %992  ;;  %v334_v15 = vmul.f32 %v333_v54, %v331_v63  ;;  %v340_v27 = vsel %vm1375_vm1, 0, %v1366_v56  ;;  %v471_v18 = vand.u32 31, %v469_v0  ;;  %v141_v19 = vxor.u32 2147483648, %v1371_v62 }
  0x6c   :  { %v1390_v30 = vpop.eup %994  ;;  %v410_v58 = vadd.s32 %v1320_v60, %v1331_v13  ;;  %v1395_v20 = vsub.s32 %v414_v44, %v417_v2  ;;  %v564_v22 = vshrl.u32 %v563_v53, 23  ;;  %v470_v23 = vshrl.u32 %v469_v0, 5 }
  0x6d   :  { %v472_v12 = vsub.s32 32, %v471_v18  ;;  %v474_v6 = vshll.u32 %v1075_v33, %v471_v18  ;;  %v560_v32 = vand.u32 2147483647, %v1317_v57  ;;  %v247_v24 = vxor.u32 2147483648, %v1384_v10 }
  0x6e   :  { %v420_v14 = vsub.s32 0, %v1395_v20  ;;  %v477_v38 = vshll.u32 %v1076_v35, %v471_v18  ;;  %v1402_v29 = vshll.u32 %v465_v7, 8  ;;  %v244_v42 = vxor.u32 2147483648, %v1390_v30 }
  0x6f   :  { %v335_v60 = vxor.u32 2147483648, %v334_v15  ;;  %v475_v13 = vshrl.u32 %v1076_v35, %v472_v12  ;;  %v478_v25 = vshrl.u32 %v1077_v37, %v472_v12  ;;  %v440_v44 = vsub.s32 4, %v1368_v8 }
  0x70   :  { %v929_v28 = vmin.u32 %v420_v14, %v1395_v20  ;;  %v480_v45 = vshll.u32 %v1077_v37, %v471_v18  ;;  %v936_v59 = vadd.s32 4294967169, %v564_v22  ;;  %v473_v16 = vshrl.u32 %v1075_v33, %v472_v12 }
  0x71   :  { %v476_v1 = vor.u32 %v475_v13, %v474_v6  ;;  %v479_v17 = vor.u32 %v478_v25, %v477_v38  ;;  %vm489_vm2 = vcmp.lt.s32.totalorder %v470_v23, 1  ;;  %vm140_vm3 = vcmp.eq.s32.totalorder %v1379_v31, 0 }
  0x72   :  { %vm143_vm4 = vcmp.eq.s32.totalorder %v1379_v31, 2  ;;  %v422_v51 = vclz %v929_v28  ;;  %v481_v40 = vshrl.u32 %v1078_v39, %v472_v12  ;;  %v483_v26 = vshll.u32 %v1078_v39, %v471_v18 }
  0x73   :  { %vm490_vm5 = vcmp.lt.s32.totalorder %v470_v23, 2  ;;  %v336_v52 = vsel %vm253_vm15, %v335_v60, %v334_v15  ;;  %v484_v54 = vshrl.u32 %v1079_v41, %v472_v12  ;;  %v486_v53 = vshll.u32 %v1079_v41, %v471_v18 }
  0x74   :  { %v487_v63 = vshrl.u32 %v1080_v49, %v472_v12  ;;  %vm246_vm6 = vcmp.eq.s32.totalorder %v1381_v43, 2  ;;  %v930_v0 = vadd.s32 4294967294, %v422_v51  ;;  %v482_v2 = vor.u32 %v481_v40, %v480_v45 }
  0x75   :  { %vm491_vm7 = vcmp.lt.s32.totalorder %v470_v23, 3  ;;  %vm492_vm8 = vcmp.lt.s32.totalorder %v470_v23, 4  ;;  %vm243_vm9 = vcmp.eq.s32.totalorder %v1381_v43, 0  ;;  %v485_v7 = vor.u32 %v484_v54, %v483_v26 }
  0x76   :  { %v488_v22 = vor.u32 %v487_v63, %v486_v53  ;;  %v493_v6 = vsel %vm489_vm2, %v473_v16, %v476_v1  ;;  %v497_v15 = vsel %vm489_vm2, %v476_v1, %v479_v17  ;;  %vm931_vm10 = vcmp.lt.s32.totalorder %v930_v0, 0 }
  0x77   :  { %v494_v14 = vsel %vm492_vm8, %v482_v2, 2102212464  ;;  %v501_v18 = vsel %vm489_vm2, %v479_v17, %v482_v2  ;;  %v570_v38 = vadd.s32 1, %v936_v59  ;;  %vm356_vm11 = vcmp.lt.s32.totalorder %v1195_v61, 0 }
  0x78   :  { %v425_v12 = vsel %vm931_vm10, 0, %v930_v0  ;;  %v495_v60 = vsel %vm491_vm7, %v479_v17, %v494_v14  ;;  %v498_v13 = vsel %vm492_vm8, %v485_v7, 920167782  ;;  %v502_v25 = vsel %vm492_vm8, %v488_v22, 1326507024 }
  0x79   :  { %v339_v28 = vsel %vm1375_vm1, %v1108_v5, %v336_v52  ;;  %v426_v45 = vsub.s32 32, %v425_v12  ;;  %v427_v16 = vshll.u32 %v1395_v20, %v425_v12  ;;  %v430_v1 = vsub.s32 4294967266, %v425_v12 }
  0x7a   :  { %v496_v51 = vsel %vm490_vm5, %v493_v6, %v495_v60  ;;  %v499_v40 = vsel %vm491_vm7, %v482_v2, %v498_v13  ;;  %v503_v59 = vsel %vm491_vm7, %v485_v7, %v502_v25  ;;  %vm571_vm12 = vcmp.gt.s32.totalorder %v570_v38, 0 }
  0x7b   :  { %v428_v26 = vshrl.u32 %v410_v58, %v426_v45  ;;  %v431_v54 = vadd.s32 127, %v430_v1  ;;  %v500_v17 = vsel %vm490_vm5, %v497_v15, %v499_v40  ;;  %v504_v53 = vsel %vm490_vm5, %v501_v18, %v503_v59 }
  0x7c   :  { %v1437_v63 = vmul.u32.u64.low %v1402_v29, %v504_v53  ;;  %v1438_v52 = vmul.u32.u64.high %v1402_v29, %v504_v53, %v1437_v63  ;;  %v1441_v20 = vmul.u32.u64.low %v1402_v29, %v500_v17  ;;  %v1442_v0 = vmul.u32.u64.high %v1402_v29, %v500_v17, %v1441_v20 }
  0x7d   :  { %996 = vcosq.f32 %v339_v28  ;;  %vm1447_vm13 = vcmp.le.f32.partialorder %v354_v36, 0.7853982  ;;  %v429_v58 = vor.u32 %v428_v26, %v427_v16  ;;  %v432_v7 = vshll.u32 %v431_v54, 23 }
  0x7e   :  { %v572_v23 = vsel %vm571_vm12, %v570_v38, 0  ;;  %v1456_v22 = vsel %vm140_vm3, %v1361_v55, %v141_v19  ;;  %v1463_v6 = vsel %vm143_vm4, %v144_v11, %v1371_v62  ;;  %v1469_v36 = vand.u32 3, %v340_v27 }
  0x7f   :  { %v574_v15 = vand.u32 31, %v572_v23  ;;  %998 = vsinq.f32 %v339_v28  ;;  %v433_v14 = vor.u32 4788187, %v432_v7  ;;  %v436_v18 = vcvt.s32.f32 %v429_v58 }
  0x80   :  { %v512_v19 = vmul.u32 %v1402_v29, %v496_v51  ;;  %v1477_v55 = vsel %vm246_vm6, %v247_v24, %v1390_v30  ;;  %vm514_vm14 = vc.u32 %v1438_v52, %v1441_v20  ;;  %v515_v56 = vadd.s32 1, %v1442_v0 }
  0x81   :  { %v567_v62 = vand.u32 8388607, %v560_v32  ;;  %v1489_v9 = vsel %vm243_vm9, %v1384_v10, %v244_v42  ;;  %v434_v11 = vand.u32 2147483647, %v433_v14  ;;  %v1496_v27 = vsel %vm356_vm11, %v440_v44, %v1368_v8 }
  0x82   :  { %v575_v24 = vsub.s32 32, %v574_v15  ;;  %v516_v29 = vsel %vm514_vm14, %v515_v56, %v1442_v0  ;;  %v1499_v38 = vshrl.u32 %v572_v23, 5  ;;  %v577_v30 = vshll.u32 %v1075_v33, %v574_v15 }
  0x83   :  { %v580_v12 = vshll.u32 %v1076_v35, %v574_v15  ;;  %v437_v60 = vmul.f32 %v436_v18, %v434_v11  ;;  %v517_v10 = vadd.s32 %v516_v29, %v512_v19  ;;  %v583_v13 = vshll.u32 %v1077_v37, %v574_v15 }
  0x84   :  { %v578_v42 = vshrl.u32 %v1076_v35, %v575_v24  ;;  %vm139_vm15 = vcmp.lt.s32.totalorder %v1379_v31, 2  ;;  %vm242_vm0 = vcmp.lt.s32.totalorder %v1381_v43, 2  ;;  %v581_v8 = vshrl.u32 %v1077_v37, %v575_v24 }
  0x85   :  { %v584_v44 = vshrl.u32 %v1078_v39, %v575_v24  ;;  %v586_v25 = vshll.u32 %v1078_v39, %v574_v15  ;;  %v587_v28 = vshrl.u32 %v1079_v41, %v575_v24  ;;  %vm346_vm1 = vcmp.eq.s32.totalorder %v1469_v36, 0 }
  0x86   :  { %vm349_vm2 = vcmp.eq.s32.totalorder %v1469_v36, 2  ;;  %v438_v45 = vxor.u32 2147483648, %v437_v60  ;;  %v518_v16 = vadd.s32 536870912, %v517_v10  ;;  %v568_v1 = vor.u32 8388608, %v567_v62 }
  0x87   :  { %v589_v51 = vshll.u32 %v1079_v41, %v574_v15  ;;  %v579_v40 = vor.u32 %v578_v42, %v577_v30  ;;  %v582_v59 = vor.u32 %v581_v8, %v580_v12  ;;  %v588_v26 = vor.u32 %v587_v28, %v586_v25  ;;  %v997_v17 = vpop.eup %996 }
  0x88   :  { %v590_v54 = vshrl.u32 %v1080_v49, %v575_v24  ;;  %v439_v53 = vsel %vm356_vm11, %v438_v45, %v437_v60  ;;  %v519_v63 = vshrl.u32 %v518_v16, 30  ;;  %v585_v0 = vor.u32 %v584_v44, %v583_v13 }
  0x89   :  { %vm592_vm3 = vcmp.lt.s32.totalorder %v1499_v38, 1  ;;  %vm137_vm4 = vweird.f32 %v1104_v3  ;;  %vm240_vm5 = vweird.f32 %v1106_v4  ;;  %v442_v58 = vsel %vm1447_vm13, %v1195_v61, %v439_v53  ;;  %v999_v23 = vpop.eup %998 }
  0x8a   :  { %v443_v7 = vsel %vm1447_vm13, 0, %v1496_v27  ;;  %vm594_vm6 = vcmp.lt.s32.totalorder %v1499_v38, 3  ;;  %vm595_vm7 = vcmp.lt.s32.totalorder %v1499_v38, 4  ;;  %vm459_vm8 = vcmp.lt.s32.totalorder %v1296_v50, 0 }
  0x8b   :  { %v520_v15 = vshll.u32 %v519_v63, 30  ;;  %v576_v14 = vshrl.u32 %v1075_v33, %v575_v24  ;;  %v591_v18 = vor.u32 %v590_v54, %v589_v51  ;;  %vm593_vm9 = vcmp.lt.s32.totalorder %v1499_v38, 2 }
  0x8c   :  { %vm345_vm10 = vcmp.lt.s32.totalorder %v1469_v36, 2  ;;  %v350_v19 = vxor.u32 2147483648, %v997_v17  ;;  %v600_v2 = vsel %vm592_vm3, %v579_v40, %v582_v59  ;;  %v601_v56 = vsel %vm595_vm7, %v588_v26, 920167782 }
  0x8d   :  { %v608_v62 = vshll.u32 %v568_v1, 8  ;;  %1000 = vcosq.f32 %v442_v58  ;;  %v1536_v11 = vsub.s32 %v517_v10, %v520_v15  ;;  %v597_v27 = vsel %vm595_vm7, %v585_v0, 2102212464 }
  0x8e   :  { %v602_v24 = vsel %vm594_vm6, %v585_v0, %v601_v56  ;;  %v347_v29 = vxor.u32 2147483648, %v999_v23  ;;  %1002 = vsinq.f32 %v442_v58  ;;  %vm1544_vm11 = vcmp.le.f32.partialorder %v457_v21, 0.7853982 }
  0x8f   :  { %v543_v12 = vsub.s32 4, %v519_v63  ;;  %v603_v60 = vsel %vm593_vm9, %v600_v2, %v602_v24  ;;  %vm343_vm12 = vweird.f32 %v1108_v5  ;;  %v523_v10 = vsub.s32 0, %v1536_v11 }
  0x90   :  { %v596_v42 = vsel %vm592_vm3, %v576_v14, %v579_v40  ;;  %v604_v13 = vsel %vm592_vm3, %v582_v59, %v585_v0  ;;  %v605_v21 = vsel %vm595_vm7, %v591_v18, 1326507024  ;;  %v598_v8 = vsel %vm594_vm6, %v582_v59, %v597_v27 }
  0x91   :  { %v606_v44 = vsel %vm594_vm6, %v588_v26, %v605_v21  ;;  %v1562_v25 = vmul.u32.u64.low %v608_v62, %v603_v60  ;;  %v1563_v28 = vmul.u32.u64.high %v608_v62, %v603_v60, %v1562_v25  ;;  %v146_v45 = vsel %vm139_vm15, %v1456_v22, %v1463_v6 }
  0x92   :  { %v249_v16 = vsel %vm242_vm0, %v1489_v9, %v1477_v55  ;;  %v1573_v1 = vand.u32 3, %v443_v7  ;;  %v933_v51 = vmin.u32 %v523_v10, %v1536_v11  ;;  %v348_v40 = vsel %vm346_vm1, %v997_v17, %v347_v29 }
  0x93   :  { %v351_v59 = vsel %vm349_vm2, %v350_v19, %v999_v23  ;;  %v607_v26 = vsel %vm593_vm9, %v604_v13, %v606_v44  ;;  %v666_v31 = vand.u32 2139095040, %v1350_v46  ;;  %v599_v43 = vsel %vm593_vm9, %v596_v42, %v598_v8 }
  0x94   :  { %v525_v22 = vclz %v933_v51  ;;  %v1585_v6 = vmul.u32.u64.low %v608_v62, %v607_v26  ;;  %v1586_v55 = vmul.u32.u64.high %v608_v62, %v607_v26, %v1585_v6  ;;  %v544_v9 = vsel %vm459_vm8, %v543_v12, %v519_v63 }
  0x95   :  { %v618_v54 = vadd.s32 1, %v1563_v28  ;;  %v663_v17 = vand.u32 2147483647, %v1350_v46  ;;  %v667_v53 = vshrl.u32 %v666_v31, 23  ;;  %v1594_v0 = vsel %vm137_vm4, nan, %v146_v45 }
  0x96   :  { %v1598_v58 = vsel %vm240_vm5, nan, %v249_v16  ;;  %vm449_vm13 = vcmp.eq.s32.totalorder %v1573_v1, 0  ;;  %v934_v38 = vadd.s32 4294967294, %v525_v22  ;;  %vm452_vm14 = vcmp.eq.s32.totalorder %v1573_v1, 2 }
  0x97   :  { %v513_v63 = vadd.s32 %v1441_v20, %v1438_v52  ;;  %v615_v7 = vmul.u32 %v608_v62, %v599_v43  ;;  %v940_v23 = vadd.s32 4294967169, %v667_v53  ;;  %v1001_v15 = vpop.eup %1000  ;;  %v352_v3 = vsel %vm345_vm10, %v348_v40, %v351_v59 }
  0x98   :  { %vm448_vm15 = vcmp.lt.s32.totalorder %v1573_v1, 2  ;;  %vm935_vm0 = vcmp.lt.s32.totalorder %v934_v38, 0  ;;  %v546_v4 = vsel %vm1544_vm11, 0, %v544_v9  ;;  %vm617_vm1 = vc.u32 %v1586_v55, %v1562_v25  ;;  %v1003_v14 = vpop.eup %1002 }
  0x99   :  { %v528_v18 = vsel %vm935_vm0, 0, %v934_v38  ;;  %v619_v19 = vsel %vm617_vm1, %v618_v54, %v1563_v28  ;;  %v670_v52 = vand.u32 8388607, %v663_v17  ;;  %v673_v20 = vadd.s32 1, %v940_v23 }
  0x9a   :  { %v529_v2 = vsub.s32 32, %v528_v18  ;;  %v530_v36 = vshll.u32 %v1536_v11, %v528_v18  ;;  %v533_v56 = vsub.s32 4294967266, %v528_v18  ;;  %v766_v62 = vand.u32 2147483647, %v1352_v47 }
  0x9b   :  { %v1617_v27 = vsel %vm343_vm12, nan, %v352_v3  ;;  %v453_v24 = vxor.u32 2147483648, %v1001_v15  ;;  %v620_v29 = vadd.s32 %v619_v19, %v615_v7  ;;  %vm674_vm2 = vcmp.gt.s32.totalorder %v673_v20, 0 }
  0x9c   :  { %v450_v12 = vxor.u32 2147483648, %v1003_v14  ;;  %v531_v60 = vshrl.u32 %v513_v63, %v529_v2  ;;  %v534_v10 = vadd.s32 127, %v533_v56  ;;  %v675_v42 = vsel %vm674_vm2, %v673_v20, 0 }
  0x9d   :  { %v1619_v13 = vand.u32 3, %v546_v4  ;;  %v621_v21 = vadd.s32 536870912, %v620_v29  ;;  %v671_v8 = vor.u32 8388608, %v670_v52  ;;  %v677_v44 = vand.u32 31, %v675_v42 }
  0x9e   :  { %v532_v11 = vor.u32 %v531_v60, %v530_v36  ;;  %v535_v28 = vshll.u32 %v534_v10, 23  ;;  %v769_v45 = vand.u32 2139095040, %v1352_v47  ;;  %v1624_v5 = vand.u32 8388607, %v766_v62 }
  0x9f   :  { %v454_v16 = vsel %vm452_vm14, %v453_v24, %v1003_v14  ;;  %v1629_v51 = vadd.s32 %v1562_v25, %v1586_v55  ;;  %v622_v40 = vshrl.u32 %v621_v21, 30  ;;  %v678_v59 = vsub.s32 32, %v677_v44 }
  0xa0   :  { %v451_v26 = vsel %vm449_vm13, %v1001_v15, %v450_v12  ;;  %v536_v31 = vor.u32 4788187, %v535_v28  ;;  %v539_v22 = vcvt.s32.f32 %v532_v11  ;;  %v1633_v43 = vshrl.u32 %v675_v42, 5 }
  0xa1   :  { %vm562_vm3 = vcmp.lt.s32.totalorder %v1317_v57, 0  ;;  %v623_v6 = vshll.u32 %v622_v40, 30  ;;  %v680_v9 = vshll.u32 %v1075_v33, %v677_v44  ;;  %v681_v54 = vshrl.u32 %v1076_v35, %v678_v59 }
  0xa2   :  { %v683_v53 = vshll.u32 %v1076_v35, %v677_v44  ;;  %v537_v25 = vand.u32 2147483647, %v536_v31  ;;  %v684_v55 = vshrl.u32 %v1077_v37, %v678_v59  ;;  %v689_v38 = vshll.u32 %v1078_v39, %v677_v44 }
  0xa3   :  { %v690_v63 = vshrl.u32 %v1079_v41, %v678_v59  ;;  %v1644_v7 = vsel %vm448_vm15, %v451_v26, %v454_v16  ;;  %v1646_v23 = vsub.s32 %v620_v29, %v623_v6  ;;  %v686_v15 = vshll.u32 %v1077_v37, %v677_v44 }
  0xa4   :  { %v687_v3 = vshrl.u32 %v1078_v39, %v678_v59  ;;  %v540_v4 = vmul.f32 %v539_v22, %v537_v25  ;;  %v646_v14 = vsub.s32 4, %v622_v40  ;;  %v692_v18 = vshll.u32 %v1079_v41, %v677_v44 }
  0xa5   :  { %v1651_v19 = vshll.u32 %v671_v8, 8  ;;  %v626_v52 = vsub.s32 0, %v1646_v23  ;;  %v682_v20 = vor.u32 %v681_v54, %v680_v9  ;;  %v685_v2 = vor.u32 %v684_v55, %v683_v53 }
  0xa6   :  { %v693_v1 = vshrl.u32 %v1080_v49, %v678_v59  ;;  %v541_v36 = vxor.u32 2147483648, %v540_v4  ;;  %v679_v56 = vshrl.u32 %v1075_v33, %v678_v59  ;;  %v691_v24 = vor.u32 %v690_v63, %v689_v38 }
  0xa7   :  { %vm695_vm4 = vcmp.lt.s32.totalorder %v1633_v43, 1  ;;  %vm1659_vm5 = vcmp.le.f32.partialorder %v560_v32, 0.7853982  ;;  %v937_v12 = vmin.u32 %v626_v52, %v1646_v23  ;;  %v688_v60 = vor.u32 %v687_v3, %v686_v15 }
  0xa8   :  { %vm696_vm6 = vcmp.lt.s32.totalorder %v1633_v43, 2  ;;  %v770_v10 = vshrl.u32 %v769_v45, 23  ;;  %vm446_vm7 = vweird.f32 %v1195_v61  ;;  %v542_v42 = vsel %vm459_vm8, %v541_v36, %v540_v4 }
  0xa9   :  { %v694_v21 = vor.u32 %v693_v1, %v692_v18  ;;  %vm697_vm9 = vcmp.lt.s32.totalorder %v1633_v43, 3  ;;  %vm698_vm10 = vcmp.lt.s32.totalorder %v1633_v43, 4  ;;  %v545_v32 = vsel %vm1544_vm11, %v1296_v50, %v542_v42 }
  0xaa   :  { %v628_v8 = vclz %v937_v12  ;;  %v700_v44 = vsel %vm698_vm10, %v688_v60, 2102212464  ;;  %v703_v11 = vsel %vm695_vm4, %v682_v20, %v685_v2  ;;  %1004 = vcosq.f32 %v545_v32 }
  0xab   :  { %v647_v28 = vsel %vm562_vm3, %v646_v14, %v622_v40  ;;  %v699_v45 = vsel %vm695_vm4, %v679_v56, %v682_v20  ;;  %v704_v16 = vsel %vm698_vm10, %v691_v24, 920167782  ;;  %1006 = vsinq.f32 %v545_v32 }
  0xac   :  { %v938_v59 = vadd.s32 4294967294, %v628_v8  ;;  %v705_v26 = vsel %vm697_vm9, %v688_v60, %v704_v16  ;;  %v707_v30 = vsel %vm695_vm4, %v685_v2, %v688_v60  ;;  %v701_v31 = vsel %vm697_vm9, %v685_v2, %v700_v44 }
  0xad   :  { %v706_v22 = vsel %vm696_vm6, %v703_v11, %v705_v26  ;;  %v708_v6 = vsel %vm698_vm10, %v694_v21, 1326507024  ;;  %v944_v40 = vadd.s32 4294967169, %v770_v10  ;;  %v774_v38 = vor.u32 8388608, %v1624_v5 }
  0xae   :  { %vm939_vm8 = vcmp.lt.s32.totalorder %v938_v59, 0  ;;  %v709_v9 = vsel %vm697_vm9, %v691_v24, %v708_v6  ;;  %v1690_v54 = vmul.u32.u64.low %v1651_v19, %v706_v22  ;;  %v1691_v53 = vmul.u32.u64.high %v1651_v19, %v706_v22, %v1690_v54 }
  0xaf   :  { %v631_v25 = vsel %vm939_vm8, 0, %v938_v59  ;;  %v710_v55 = vsel %vm696_vm6, %v707_v30, %v709_v9  ;;  %v776_v63 = vadd.s32 1, %v944_v40  ;;  %v702_v14 = vsel %vm696_vm6, %v699_v45, %v701_v31 }
  0xb0   :  { %v632_v15 = vsub.s32 32, %v631_v25  ;;  %v633_v3 = vshll.u32 %v1646_v23, %v631_v25  ;;  %v636_v4 = vsub.s32 4294967266, %v631_v25  ;;  %v649_v18 = vsel %vm1659_vm5, 0, %v647_v28 }
  0xb1   :  { %v1703_v52 = vmul.u32.u64.low %v1651_v19, %v710_v55  ;;  %v1704_v20 = vmul.u32.u64.high %v1651_v19, %v710_v55, %v1703_v52  ;;  %vm777_vm11 = vcmp.gt.s32.totalorder %v776_v63, 0  ;;  %v721_v5 = vadd.s32 1, %v1691_v53 }
  0xb2   :  { %v634_v2 = vshrl.u32 %v1629_v51, %v632_v15  ;;  %v637_v1 = vadd.s32 127, %v636_v4  ;;  %v778_v36 = vsel %vm777_vm11, %v776_v63, 0  ;;  %vm549_vm12 = vweird.f32 %v1296_v50  ;;  %v1020_v4 = vld [vmem:[#allocation2] sm:$0x3f] }
  0xb3   :  { %vm551_vm13 = vcmp.lt.s32.totalorder %v1619_v13, 2  ;;  %vm552_vm14 = vcmp.eq.s32.totalorder %v1619_v13, 0  ;;  %v718_v43 = vmul.u32 %v1651_v19, %v702_v14  ;;  %v780_v23 = vand.u32 31, %v778_v36  ;;  %v1022_v14 = vld [vmem:[#allocation2 + $0x10] sm:$0x3f] }
  0xb4   :  { %v1715_v56 = vsel %vm446_vm7, nan, %v1644_v7  ;;  %vm555_vm15 = vcmp.eq.s32.totalorder %v1619_v13, 2  ;;  %v635_v51 = vor.u32 %v634_v2, %v633_v3  ;;  %v638_v24 = vshll.u32 %v637_v1, 23  ;;  %v1005_v12 = vpop.eup %1004  ;;  %v1023_v13 = vld [vmem:[#allocation2 + $0x18] sm:$0x3f] }
  0xb5   :  { %v1718_v60 = vand.u32 3, %v649_v18  ;;  %vm720_vm0 = vc.u32 %v1704_v20, %v1690_v54  ;;  %v781_v10 = vsub.s32 32, %v780_v23  ;;  %v1722_v42 = vshll.u32 %v774_v38, 8  ;;  %v1007_v19 = vpop.eup %1006 }
  0xb6   :  { %v556_v21 = vxor.u32 2147483648, %v1005_v12  ;;  %v639_v32 = vor.u32 4788187, %v638_v24  ;;  %v642_v8 = vcvt.s32.f32 %v635_v51  ;;  %v722_v61 = vsel %vm720_vm0, %v721_v5, %v1691_v53 }
  0xb7   :  { %v553_v7 = vxor.u32 2147483648, %v1007_v19  ;;  %v723_v44 = vadd.s32 %v722_v61, %v718_v43  ;;  %v869_v11 = vmul.f32 0.5, %v1594_v0  ;;  %v870_v28 = vmul.f32 0.5, %v1598_v58 }
  0xb8   :  { %v557_v45 = vsel %vm555_vm15, %v556_v21, %v1007_v19  ;;  %v640_v16 = vand.u32 2147483647, %v639_v32  ;;  %v783_v59 = vshll.u32 %v1075_v33, %v780_v23  ;;  %v784_v26 = vshrl.u32 %v1076_v35, %v781_v10 }
  0xb9   :  { %v554_v30 = vsel %vm552_vm14, %v1005_v12, %v553_v7  ;;  %v724_v31 = vadd.s32 536870912, %v723_v44  ;;  %v786_v22 = vshll.u32 %v1076_v35, %v780_v23  ;;  %v787_v6 = vshrl.u32 %v1077_v37, %v781_v10 }
  0xba   :  { %v643_v40 = vmul.f32 %v642_v8, %v640_v16  ;;  %v779_v0 = vshrl.u32 %v778_v36, 5  ;;  %v789_v58 = vshll.u32 %v1077_v37, %v780_v23  ;;  %v790_v9 = vshrl.u32 %v1078_v39, %v781_v10  ;;  %v1021_v37 = vld [vmem:[#allocation2 + $0x8] sm:$0x3f] }
  0xbb   :  { %v558_v53 = vsel %vm551_vm13, %v554_v30, %v557_v45  ;;  %v1739_v25 = vshrl.u32 %v724_v31, 30  ;;  %v792_v55 = vshll.u32 %v1078_v39, %v780_v23  ;;  %v793_v38 = vshrl.u32 %v1079_v41, %v781_v10 }
  0xbc   :  { %v644_v63 = vxor.u32 2147483648, %v643_v40  ;;  %v795_v35 = vshll.u32 %v1079_v41, %v780_v23  ;;  %v796_v15 = vshrl.u32 %v1080_v49, %v781_v10  ;;  %v871_v3 = vmul.f32 0.5, %v1617_v27 }
  0xbd   :  { %vm37_vm1 = vcmp.lt.f32.partialorder %v1020_v4, 5.0  ;;  %vm38_vm2 = vcmp.lt.f32.partialorder %v1021_v37, 5.0  ;;  %vm39_vm4 = vcmp.lt.f32.partialorder %v1022_v14, 5.0  ;;  %vm40_vm6 = vcmp.lt.f32.partialorder %v1023_v13, 5.0 }
  0xbe   :  { %v726_v18 = vshll.u32 %v1739_v25, 30  ;;  %v782_v39 = vshrl.u32 %v1075_v33, %v781_v10  ;;  %v785_v52 = vor.u32 %v784_v26, %v783_v59  ;;  %v788_v2 = vor.u32 %v787_v6, %v786_v22 }
  0xbf   :  { %vm41_vm7 = vcmp.lt.f32.partialorder %v1284_v34, 5.0  ;;  %v559_v41 = vsel %vm549_vm12, nan, %v558_v53  ;;  %v645_v49 = vsel %vm562_vm3, %v644_v63, %v643_v40  ;;  %v791_v27 = vor.u32 %v790_v9, %v789_v58 }
  0xc0   :  { %v794_v1 = vor.u32 %v793_v38, %v792_v55  ;;  %v648_v5 = vsel %vm1659_vm5, %v1317_v57, %v645_v49  ;;  %v1756_v36 = vsub.s32 %v723_v44, %v726_v18  ;;  %vm798_vm9 = vcmp.lt.s32.totalorder %v779_v0, 1 }
  0xc1   :  { %vm801_vm10 = vcmp.lt.s32.totalorder %v779_v0, 4  ;;  %1008 = vcosq.f32 %v648_v5  ;;  %v797_v33 = vor.u32 %v796_v15, %v795_v35  ;;  %vm800_vm8 = vcmp.lt.s32.totalorder %v779_v0, 3 }
  0xc2   :  { %v803_v43 = vsel %vm801_vm10, %v791_v27, 2102212464  ;;  %1010 = vsinq.f32 %v648_v5  ;;  %v729_v50 = vsub.s32 0, %v1756_v36  ;;  %v802_v23 = vsel %vm798_vm9, %v782_v39, %v785_v52 }
  0xc3   :  { %v804_v51 = vsel %vm800_vm8, %v788_v2, %v803_v43  ;;  %vm799_vm3 = vcmp.lt.s32.totalorder %v779_v0, 2  ;;  %v806_v24 = vsel %vm798_vm9, %v785_v52, %v788_v2  ;;  %v807_v29 = vsel %vm801_vm10, %v794_v1, 920167782 }
  0xc4   :  { %v872_v12 = vmul.f32 0.5, %v1715_v56  ;;  %v941_v10 = vmin.u32 %v729_v50, %v1756_v36  ;;  %v810_v19 = vsel %vm798_vm9, %v788_v2, %v791_v27  ;;  %v877_v21 = vadd.f32 0.5, %v869_v11 }
  0xc5   :  { %v878_v32 = vadd.f32 0.5, %v870_v28  ;;  %v805_v8 = vsel %vm799_vm3, %v802_v23, %v804_v51  ;;  %v808_v61 = vsel %vm800_vm8, %v791_v27, %v807_v29  ;;  %v811_v7 = vsel %vm801_vm10, %v797_v33, 1326507024 }
  0xc6   :  { %v873_v44 = vmul.f32 0.5, %v559_v41  ;;  %vm652_vm5 = vweird.f32 %v1317_v57  ;;  %v731_v45 = vclz %v941_v10  ;;  %v809_v16 = vsel %vm799_vm3, %v806_v24, %v808_v61 }
  0xc7   :  { %v812_v59 = vsel %vm800_vm8, %v794_v1, %v811_v7  ;;  %v879_v56 = vadd.f32 0.5, %v871_v3  ;;  %v1772_v11 = vmul.u32.u64.low %v1722_v42, %v809_v16  ;;  %v1773_v28 = vmul.u32.u64.high %v1722_v42, %v809_v16, %v1772_v11 }
  0xc8   :  { %v813_v26 = vsel %vm799_vm3, %v810_v19, %v812_v59  ;;  %v880_v30 = vadd.f32 0.5, %v872_v12  ;;  %v942_v31 = vadd.s32 4294967294, %v731_v45  ;;  %v881_v40 = vadd.f32 0.5, %v873_v44 }
  0xc9   :  { %v1776_v22 = vmul.u32.u64.low %v1722_v42, %v813_v26  ;;  %v1777_v6 = vmul.u32.u64.high %v1722_v42, %v813_v26, %v1776_v22  ;;  %v885_v58 = vsel %vm37_vm1, %v877_v21, 0.0  ;;  %v886_v9 = vsel %vm38_vm2, %v878_v32, 0.0 }
  0xca   :  { %v887_v53 = vsel %vm39_vm4, %v879_v56, 0.0  ;;  %v888_v0 = vsel %vm40_vm6, %v880_v30, 0.0  ;;  %vm655_vm11 = vcmp.eq.s32.totalorder %v1718_v60, 0  ;;  %v719_v55 = vadd.s32 %v1690_v54, %v1704_v20  ;;  %893 = vst [vmem:[#allocation5] sm:$0x3f] %v885_v58 }
  0xcb   :  { %vm943_vm12 = vcmp.lt.s32.totalorder %v942_v31, 0  ;;  %v889_v38 = vsel %vm41_vm7, %v881_v40, 0.0  ;;  %894 = vst [vmem:[#allocation5 + $0x8] sm:$0x3f] %v886_v9  ;;  %895 = vst [vmem:[#allocation5 + $0x10] sm:$0x3f] %v887_v53  ;;  %v1009_v63 = vpop.eup %1008  ;;  %v821_v15 = vmul.u32 %v1722_v42, %v805_v8  ;;  %v822_v13 = vadd.s32 %v1772_v11, %v1777_v6 }
  0xcc   :  { %896 = vst [vmem:[#allocation5 + $0x18] sm:$0x3f] %v888_v0  ;;  %vm658_vm13 = vcmp.eq.s32.totalorder %v1718_v60, 2  ;;  %v734_v35 = vsel %vm943_vm12, 0, %v942_v31  ;;  %v824_v3 = vadd.s32 1, %v1773_v28  ;;  %v1011_v4 = vpop.eup %1010  ;;  %v659_v37 = vxor.u32 2147483648, %v1009_v63 }
  0xcd   :  { %897 = vst [vmem:[#allocation5 + $0x20] sm:$0x3f] %v889_v38  ;;  %v735_v54 = vsub.s32 32, %v734_v35  ;;  %v736_v20 = vshll.u32 %v1756_v36, %v734_v35  ;;  %v739_v34 = vsub.s32 4294967266, %v734_v35  ;;  %vm654_vm14 = vcmp.lt.s32.totalorder %v1718_v60, 2 }
  0xce   :  { %v656_v14 = vxor.u32 2147483648, %v1011_v4  ;;  %vm823_vm15 = vc.u32 %v1777_v6, %v1772_v11  ;;  %v660_v18 = vsel %vm658_vm13, %v659_v37, %v1011_v4  ;;  %vm42_vm0 = vcmp.lt.f32.partialorder %v1293_v48, 5.0 }
  0xcf   :  { %v737_v39 = vshrl.u32 %v719_v55, %v735_v54  ;;  %v740_v52 = vadd.s32 127, %v739_v34  ;;  %v825_v42 = vsel %vm823_vm15, %v824_v3, %v1773_v28  ;;  %vm665_vm1 = vcmp.lt.s32.totalorder %v1350_v46, 0  ;;  %v1024_v3 = vld [vmem:[#allocation2 + $0x30] sm:$0x3f] }
  0xd0   :  { %v657_v2 = vsel %vm655_vm11, %v1009_v63, %v656_v14  ;;  %v826_v41 = vadd.s32 %v825_v42, %v821_v15  ;;  %vm664_vm2 = vcmp.le.f32.partialorder %v663_v17, 0.7853982  ;;  %v749_v19 = vsub.s32 4, %v1739_v25 }
  0xd1   :  { %v661_v49 = vsel %vm654_vm14, %v657_v2, %v660_v18  ;;  %v738_v27 = vor.u32 %v737_v39, %v736_v20  ;;  %v741_v1 = vshll.u32 %v740_v52, 23  ;;  %vm755_vm10 = vweird.f32 %v1350_v46 }
  0xd2   :  { %v662_v5 = vsel %vm652_vm5, nan, %v661_v49  ;;  %v827_v36 = vadd.s32 536870912, %v826_v41  ;;  %v750_v61 = vsel %vm665_vm1, %v749_v19, %v1739_v25  ;;  %vm43_vm8 = vcmp.lt.f32.partialorder %v1024_v3, 5.0 }
  0xd3   :  { %v742_v33 = vor.u32 4788187, %v741_v1  ;;  %v745_v43 = vcvt.s32.f32 %v738_v27  ;;  %v874_v50 = vmul.f32 0.5, %v662_v5  ;;  %v752_v44 = vsel %vm664_vm2, 0, %v750_v61  ;;  %v1025_v5 = vld [vmem:[#allocation2 + $0x38] sm:$0x3f] }
  0xd4   :  { %v828_v23 = vshrl.u32 %v827_v36, 30  ;;  %v756_v16 = vand.u32 3, %v752_v44  ;;  %vm768_vm3 = vcmp.lt.s32.totalorder %v1352_v47, 0  ;;  %vm767_vm5 = vcmp.le.f32.partialorder %v766_v62, 0.7853982 }
  0xd5   :  { %v743_v51 = vand.u32 2147483647, %v742_v33  ;;  %v882_v24 = vadd.f32 0.5, %v874_v50  ;;  %vm858_vm14 = vweird.f32 %v1352_v47  ;;  %vm44_vm15 = vcmp.lt.f32.partialorder %v1025_v5, 5.0 }
  0xd6   :  { %v829_v29 = vshll.u32 %v828_v23, 30  ;;  %vm761_vm6 = vcmp.eq.s32.totalorder %v756_v16, 2  ;;  %vm758_vm7 = vcmp.eq.s32.totalorder %v756_v16, 0  ;;  %vm757_vm9 = vcmp.lt.s32.totalorder %v756_v16, 2 }
  0xd7   :  { %v746_v12 = vmul.f32 %v745_v43, %v743_v51  ;;  %v890_v60 = vsel %vm42_vm0, %v882_v24, 0.0  ;;  %v852_v37 = vsub.s32 4, %v828_v23 }
  0xd8   :  { %v830_v10 = vsub.s32 %v826_v41, %v829_v29  ;;  %898 = vst [vmem:[#allocation5 + $0x28] sm:$0x3f] %v890_v60 }
  0xd9   :  { %v747_v57 = vxor.u32 2147483648, %v746_v12  ;;  %v853_v14 = vsel %vm768_vm3, %v852_v37, %v828_v23 }
  0xda   :  { %v832_v21 = vsub.s32 0, %v830_v10 }
  0xdb   :  { %v748_v32 = vsel %vm665_vm1, %v747_v57, %v746_v12 }
  0xdc   :  { %v751_v48 = vsel %vm664_vm2, %v1350_v46, %v748_v32  ;;  %v945_v8 = vmin.u32 %v832_v21, %v830_v10 }
  0xdd   :  { %1012 = vcosq.f32 %v751_v48 }
  0xde   :  { %1014 = vsinq.f32 %v751_v48  ;;  %v834_v7 = vclz %v945_v8 }
  0xe0   :  { %v946_v45 = vadd.s32 4294967294, %v834_v7 }
  0xe2   :  { %vm947_vm4 = vcmp.lt.s32.totalorder %v946_v45, 0 }
  0xe3   :  { %v837_v59 = vsel %vm947_vm4, 0, %v946_v45 }
  0xe4   :  { %v838_v56 = vsub.s32 32, %v837_v59  ;;  %v839_v17 = vshll.u32 %v830_v10, %v837_v59  ;;  %v842_v26 = vsub.s32 4294967266, %v837_v59 }
  0xe6   :  { %v840_v11 = vshrl.u32 %v822_v13, %v838_v56  ;;  %v843_v28 = vadd.s32 127, %v842_v26  ;;  %v855_v13 = vsel %vm767_vm5, 0, %v853_v14 }
  0xe7   :  { %v1013_v30 = vpop.eup %1012  ;;  %v859_v18 = vand.u32 3, %v855_v13 }
  0xe8   :  { %v1015_v31 = vpop.eup %1014  ;;  %v762_v22 = vxor.u32 2147483648, %v1013_v30  ;;  %v841_v6 = vor.u32 %v840_v11, %v839_v17  ;;  %v844_v25 = vshll.u32 %v843_v28, 23 }
  0xe9   :  { %v759_v40 = vxor.u32 2147483648, %v1015_v31  ;;  %vm864_vm11 = vcmp.eq.s32.totalorder %v859_v18, 2  ;;  %vm861_vm12 = vcmp.eq.s32.totalorder %v859_v18, 0  ;;  %vm860_vm13 = vcmp.lt.s32.totalorder %v859_v18, 2 }
  0xea   :  { %v763_v58 = vsel %vm761_vm6, %v762_v22, %v1015_v31  ;;  %v845_v9 = vor.u32 4788187, %v844_v25  ;;  %v848_v53 = vcvt.s32.f32 %v841_v6 }
  0xeb   :  { %v760_v0 = vsel %vm758_vm7, %v1013_v30, %v759_v40 }
  0xec   :  { %v764_v55 = vsel %vm757_vm9, %v760_v0, %v763_v58  ;;  %v846_v38 = vand.u32 2147483647, %v845_v9 }
  0xed   :  { %v765_v63 = vsel %vm755_vm10, nan, %v764_v55 }
  0xee   :  { %v849_v35 = vmul.f32 %v848_v53, %v846_v38  ;;  %v875_v15 = vmul.f32 0.5, %v765_v63 }
  0xf0   :  { %v850_v4 = vxor.u32 2147483648, %v849_v35  ;;  %v883_v54 = vadd.f32 0.5, %v875_v15 }
  0xf2   :  { %v851_v46 = vsel %vm768_vm3, %v850_v4, %v849_v35  ;;  %v891_v20 = vsel %vm43_vm8, %v883_v54, 0.0 }
  0xf3   :  { %v854_v34 = vsel %vm767_vm5, %v1352_v47, %v851_v46  ;;  %899 = vst [vmem:[#allocation5 + $0x30] sm:$0x3f] %v891_v20 }
  0xf4   :  { %1016 = vcosq.f32 %v854_v34 }
  0xf5   :  { %1018 = vsinq.f32 %v854_v34 }
  0xfe   :  { %v1017_v39 = vpop.eup %1016 }
  0xff   :  { %v1019_v52 = vpop.eup %1018  ;;  %v865_v42 = vxor.u32 2147483648, %v1017_v39 }
 0x100   :  { %v862_v62 = vxor.u32 2147483648, %v1019_v52 }
 0x101   :  { %v866_v2 = vsel %vm864_vm11, %v865_v42, %v1019_v52 }
 0x102   :  { %v863_v41 = vsel %vm861_vm12, %v1017_v39, %v862_v62 }
 0x103   :  { %v867_v49 = vsel %vm860_vm13, %v863_v41, %v866_v2 }
 0x104   :  { %v868_v27 = vsel %vm858_vm14, nan, %v867_v49 }
 0x105   :  { %v876_v1 = vmul.f32 0.5, %v868_v27 }
 0x107   :  { %v884_v36 = vadd.f32 0.5, %v876_v1 }
 0x109   :  { %v892_v33 = vsel %vm44_vm15, %v884_v36, 0.0 }
 0x10a   :  { %900 = vst [vmem:[#allocation5 + $0x38] sm:$0x3f] %v892_v33 }
 0x10b   :  { %1059 = shalt.err (!%p1056_p12)
}
 0x10c   :  { %s1060_s22 = scalar_lea.hbm %s1826_s1, 1024 }
 0x10d   :  { %p1061_p13 = scmp.ne.s32.totalorder %s1826_s1, %s1060_s22  ;;  %p1064_p0 = scmp.lt.u32.totalorder %s1060_s22, %s1826_s1 }
 0x10f   :  { %p1066_p1 = pnand %p1064_p0, %p1061_p13 }
 0x111   :  { %1069 = shalt.err (!%p1066_p1)
}
 0x112   :  { %910 = dma.vmem_to_hbm [thread:$0]  %s908_s18, 1024, %s1826_s1, [#allocation4]  }
 0x113   :  { %1072 = dma.done.wait [#allocation4], 1024  }
 0x114   :  { %1073 = vsyncadd [#allocation4], 4294966272 }
 0x115   :  { %914 = vsyncpa [#allocation3], 1 }
 0x116   :  { %915 = vsyncpa [#allocation4], 1 }

</bundles_post_ra>
